<compile_context>
chip_gen: v7x
topology: tpu7x:2x2x1
jax: 0.10.0
libtpu: 0.0.40
codegen_flags: <defaults>
</compile_context>

<pallas_src>
import jax
import jax.numpy as jnp
import numpy as np
from jax import lax
from jax.experimental import pallas as pl
from jax.experimental.pallas import tpu as pltpu

H = 128       # SRU hidden size (fc expects 2 * 128 = 256 features)
B_BLK = 8     # batch rows per grid step (one f32 vreg sublane block)


def _gate_sigmoid(z):
    """sigmoid(z) = 1 / (1 + exp(-z)) via EUP exp + approx EUP reciprocal + 1 NR step."""
    z = jnp.maximum(z, -30.0)            # avoid exp overflow; sigmoid(-30) ~ 1e-13
    d = 1.0 + jnp.exp(-z)
    y = pl.reciprocal(d, approx=True)
    return y * (2.0 - d * y)             # Newton refinement -> ~f32 accuracy


def sru_model_kernel(emb_ref, w_ref, v_ref, b_ref, fcw_ref, fcb_ref, out_ref, u_ref):
    # emb_ref: (L*B_BLK, E) bf16, row (t*B_BLK + b) = (time t, in-block batch b)
    # w_ref:   (E, 4H) bf16       v_ref / b_ref / fcw_ref: (2, H) f32
    # fcb_ref: (1, 1) f32         out_ref: (B_BLK, 128) f32 (lane-broadcast prob per row)
    # u_ref:   (L*B_BLK, 4H) f32 scratch
    n_blk = out_ref.shape[0]
    L = emb_ref.shape[0] // n_blk

    # Hot path 1: one big MXU call per block (M = L * B_BLK rows), bf16 x bf16 -> f32.
    u_ref[...] = jnp.dot(emb_ref[...], w_ref[...], preferred_element_type=jnp.float32)

    # Hoisted full-vreg broadcasts of the per-gate parameter vectors (not re-broadcast per step).
    vf = jnp.broadcast_to(v_ref[0:1, :], (n_blk, H))
    vr = jnp.broadcast_to(v_ref[1:2, :], (n_blk, H))
    bf = jnp.broadcast_to(b_ref[0:1, :], (n_blk, H))
    br = jnp.broadcast_to(b_ref[1:2, :], (n_blk, H))

    # Hot path 2: sequential SRU recurrence with online avg/max pooling.
    # c / running-sum / running-max are carried as fori_loop vreg values (no VMEM stores).
    def step(t, carry):
        c, s, m = carry                                   # each (n_blk, H) f32
        row = pl.multiple_of(t * n_blk, n_blk)
        u_t = u_ref[pl.ds(row, n_blk), :]                 # aligned (8, 4H) full-tile load
        x_tilde = u_t[:, 0 * H:1 * H]
        f_pre = u_t[:, 1 * H:2 * H]
        r_pre = u_t[:, 2 * H:3 * H]
        x_proj = u_t[:, 3 * H:4 * H]

        f = _gate_sigmoid(f_pre + vf * c + bf)
        c = f * c + (1.0 - f) * x_tilde
        r = _gate_sigmoid(r_pre + vr * c + br)
        h = r * c + (1.0 - r) * x_proj
        return c, s + h, jnp.maximum(m, h)

    zeros = jnp.zeros((n_blk, H), jnp.float32)
    init = (zeros, zeros, jnp.full((n_blk, H), -jnp.inf, jnp.float32))
    if L <= 32:
        unroll = L                                        # fully unroll short sequences
    else:
        unroll = next((u for u in (8, 4, 2) if L % u == 0), 1)
    _, s_sum, h_max = lax.fori_loop(0, L, step, init, unroll=unroll)

    # Hot path 3: fc(concat([avg, max])) + sigmoid, fused as a lane reduction.
    w_avg = jnp.broadcast_to(fcw_ref[0:1, :], (n_blk, H))
    w_max = jnp.broadcast_to(fcw_ref[1:2, :], (n_blk, H))
    avg = s_sum * (1.0 / L)
    logit = jnp.sum(avg * w_avg + h_max * w_max, axis=-1, keepdims=True) + fcb_ref[...]
    prob = jax.nn.sigmoid(logit)                          # (n_blk, 1)
    out_ref[...] = jnp.broadcast_to(prob, out_ref.shape)  # lane-dense unmasked store


def sru_model_forward(x_idx, params):
    """x_idx: (B, L) int32 token ids -> (B, 1) f32 probabilities."""
    B, L = x_idx.shape
    assert L >= 1, "sequence length must be >= 1"
    E = params["embedding"].shape[1]
    nb = pl.cdiv(B, B_BLK)
    B_pad = nb * B_BLK

    # Embedding lookup (frozen table) + batch padding, done in plain JAX (glue).
    # Padded batch rows are independent in the per-row recurrence/pooling and sliced off below.
    # TODO(synk): move the gather in-kernel via scalar-prefetched token ids to avoid the
    #             (B, L, E) HBM round trip for large batch * sequence.
    x_pad = jnp.pad(x_idx, ((0, B_pad - B), (0, 0)))
    emb = jnp.take(params["embedding"], x_pad, axis=0).astype(jnp.float32)   # (B_pad, L, E)
    # Dropout(p=0.3): identity at inference.

    # Reorder to block-major, time-major-within-block rows; cast MXU inputs to bf16.
    #   flat row (g*L + t) * B_BLK + i  <->  (batch g*B_BLK + i, time t)
    emb2 = (emb.reshape(nb, B_BLK, L, E)
               .transpose(0, 2, 1, 3)
               .reshape(nb * L * B_BLK, E)
               .astype(jnp.bfloat16))
    w_bf16 = params["w"].astype(jnp.bfloat16)

    # VMEM budget: f32 U scratch + double-buffered emb/out blocks + weights.
    # Capped at 64 MiB so the same setting is valid on v5e/v6e (128 MiB) and v7x (64 MiB).
    u_bytes = L * B_BLK * 4 * H * 4
    io_bytes = 2 * (L * B_BLK * E * 2 + B_BLK * 128 * 4)
    w_bytes = 2 * (E * 4 * H * 2 + 3 * 2 * H * 4 + 4)
    vmem_limit = int(min(64 * 2**20, max(32 * 2**20, 2 * (u_bytes + io_bytes + w_bytes))))
    # TODO(synk): for very long L on v7x, add an "arbitrary" L-chunk grid axis carrying
    #             (c, sum, max) in scratch across chunks instead of one (L*B_BLK, 4H) U.

    out = pl.pallas_call(
        sru_model_kernel,
        out_shape=jax.ShapeDtypeStruct((B_pad, 128), jnp.float32),
        grid_spec=pltpu.PrefetchScalarGridSpec(
            num_scalar_prefetch=0,
            grid=(nb,),
            in_specs=[
                pl.BlockSpec((L * B_BLK, E), lambda g: (g, 0)),   # embedded rows per block
                pl.BlockSpec((E, 4 * H), lambda g: (0, 0)),       # SRU weight (bf16)
                pl.BlockSpec((2, H), lambda g: (0, 0)),           # v_f / v_r
                pl.BlockSpec((2, H), lambda g: (0, 0)),           # b_f / b_r
                pl.BlockSpec((2, H), lambda g: (0, 0)),           # fc weight split [avg; max]
                pl.BlockSpec((1, 1), lambda g: (0, 0)),           # fc bias
            ],
            out_specs=pl.BlockSpec((B_BLK, 128), lambda g: (g, 0)),
            scratch_shapes=[
                pltpu.VMEM((L * B_BLK, 4 * H), jnp.float32),      # U projection
            ],
        ),
        compiler_params=pltpu.CompilerParams(
            dimension_semantics=("parallel",),                    # megacore-shardable on v7x
            vmem_limit_bytes=vmem_limit,
        ),
    )(emb2, w_bf16, params["v"], params["b"], params["fc_w"], params["fc_b"])

    return out[:B, :1]                                            # (B, 1)


def sru_model_reference(x_idx, params):
    """Pure-JAX reference (projection inputs cast to bf16 to match the kernel's MXU precision)."""
    emb = jnp.take(params["embedding"], x_idx, axis=0).astype(jnp.float32)    # (B, L, E)
    U = jnp.einsum("ble,ek->blk",
                   emb.astype(jnp.bfloat16), params["w"].astype(jnp.bfloat16),
                   preferred_element_type=jnp.float32)                        # (B, L, 4H)
    xt, fp, rp, xp = jnp.split(U, 4, axis=-1)
    vf, vr = params["v"][0], params["v"][1]
    bf, br = params["b"][0], params["b"][1]

    def step(c, u):
        xt_t, fp_t, rp_t, xp_t = u
        f = jax.nn.sigmoid(fp_t + vf * c + bf)
        c_new = f * c + (1.0 - f) * xt_t
        r = jax.nn.sigmoid(rp_t + vr * c_new + br)
        h = r * c_new + (1.0 - r) * xp_t
        return c_new, h

    B = emb.shape[0]
    c0 = jnp.zeros((B, H), jnp.float32)
    xs = tuple(jnp.swapaxes(a, 0, 1) for a in (xt, fp, rp, xp))               # (L, B, H)
    _, hs = lax.scan(step, c0, xs)                                            # (L, B, H)
    hs = jnp.swapaxes(hs, 0, 1)                                               # (B, L, H)
    avg = hs.mean(axis=1)
    mx = hs.max(axis=1)
    logit = avg @ params["fc_w"][0] + mx @ params["fc_w"][1] + params["fc_b"][0, 0]
    return jax.nn.sigmoid(logit)[:, None]


if __name__ == "__main__":
    vocab, E, L, B = 100, 32, 8, 2
    key = jax.random.PRNGKey(0)
    k = jax.random.split(key, 6)

    # Deterministic synthetic parameters (shapes implied by the module).
    params = {
        "embedding": jax.random.normal(k[0], (vocab, E), jnp.float32) * 0.1,     # pretrained emb
        "w":    jax.random.normal(k[1], (E, 4 * H), jnp.float32) / jnp.sqrt(E),  # SRU weight
        "v":    jax.random.normal(k[2], (2, H), jnp.float32) * 0.1,              # v_f, v_r
        "b":    jax.random.normal(k[3], (2, H), jnp.float32) * 0.1,              # b_f, b_r
        "fc_w": jax.random.normal(k[4], (2, H), jnp.float32) * 0.05,             # Linear(256,1) split
        "fc_b": jnp.full((1, 1), 0.1, jnp.float32),
    }
    x = jax.random.randint(k[5], (B, L), 0, vocab, dtype=jnp.int32)

    out = jax.block_until_ready(sru_model_forward(x, params))
    ref = jax.block_until_ready(sru_model_reference(x, params))

    assert out.shape == (B, 1), out.shape
    # bf16 MXU inputs are matched in the reference; the remaining kernel-only delta is the
    # NR-refined approximate-reciprocal gate sigmoid (~1e-5 relative), so 1e-3 is comfortable.
    np.testing.assert_allclose(np.asarray(out), np.asarray(ref), rtol=1e-3, atol=1e-3)
    print("KERNEL_OK")
</pallas_src>

<mosaic_0001>
module attributes {stable_mosaic.version = 11 : i64} {
  func.func @sru_model_kernel(%arg0: i32, %arg1: memref<64x32xbf16, #tpu.memory_space<vmem>>, %arg2: memref<32x512xbf16, #tpu.memory_space<vmem>>, %arg3: memref<2x128xf32, #tpu.memory_space<vmem>>, %arg4: memref<2x128xf32, #tpu.memory_space<vmem>>, %arg5: memref<2x128xf32, #tpu.memory_space<vmem>>, %arg6: memref<1x1xf32, #tpu.memory_space<vmem>>, %arg7: memref<8x128xf32, #tpu.memory_space<vmem>>, %arg8: memref<64x512xf32, #tpu.memory_space<vmem>>) attributes {dimension_semantics = [#tpu.dimension_semantics<parallel>], iteration_bounds = array<i64: 1>, scalar_prefetch = 0 : i64, scratch_operands = 1 : i64, tpu.core_type = #tpu.core_type<tc>, window_params = [{transform_indices = @transform_0, window_bounds = array<i64: 64, 32>}, {pipeline_mode = #tpu.pipeline_mode<synchronous>, transform_indices = @transform_1, window_bounds = array<i64: 32, 512>}, {pipeline_mode = #tpu.pipeline_mode<synchronous>, transform_indices = @transform_2, window_bounds = array<i64: 2, 128>}, {pipeline_mode = #tpu.pipeline_mode<synchronous>, transform_indices = @transform_3, window_bounds = array<i64: 2, 128>}, {pipeline_mode = #tpu.pipeline_mode<synchronous>, transform_indices = @transform_4, window_bounds = array<i64: 2, 128>}, {pipeline_mode = #tpu.pipeline_mode<synchronous>, transform_indices = @transform_5, window_bounds = array<i64: 1, 1>}, {transform_indices = @transform_6, window_bounds = array<i64: 8, 128>}]} {
    %c0 = arith.constant 0 : index
    %c0_0 = arith.constant 0 : index
    %0 = vector.load %arg1[%c0, %c0_0] : memref<64x32xbf16, #tpu.memory_space<vmem>>, vector<64x32xbf16>
    %c0_1 = arith.constant 0 : index
    %c0_2 = arith.constant 0 : index
    %1 = vector.load %arg2[%c0_1, %c0_2] : memref<32x512xbf16, #tpu.memory_space<vmem>>, vector<32x512xbf16>
    %cst = arith.constant dense<0.000000e+00> : vector<64x512xf32>
    %2 = tpu.matmul %0, %1, %cst {dimension_numbers = #tpu.dot_dimension_numbers<[1], [0], [0], [1], [0, 0, 1, 1], [], []>} : vector<64x32xbf16>, vector<32x512xbf16>, vector<64x512xf32> -> vector<64x512xf32>
    %c0_3 = arith.constant 0 : index
    %c0_4 = arith.constant 0 : index
    %3 = vector.load %arg8[%c0_3, %c0_4] : memref<64x512xf32, #tpu.memory_space<vmem>>, vector<64x512xf32>
    tpu.vector_store %arg8[%c0_3, %c0_4], %2 {strides = array<i32>} : memref<64x512xf32, #tpu.memory_space<vmem>>, vector<64x512xf32>,
    %c0_5 = arith.constant 0 : index
    %c0_6 = arith.constant 0 : index
    %4 = vector.load %arg3[%c0_5, %c0_6] : memref<2x128xf32, #tpu.memory_space<vmem>>, vector<1x128xf32>
    %5 = vector.shape_cast %4 : vector<1x128xf32> to vector<1x128xf32>
    %6 = vector.broadcast %5 : vector<1x128xf32> to vector<8x128xf32>
    %c1 = arith.constant 1 : index
    %c0_7 = arith.constant 0 : index
    %7 = vector.load %arg3[%c1, %c0_7] : memref<2x128xf32, #tpu.memory_space<vmem>>, vector<1x128xf32>
    %8 = vector.shape_cast %7 : vector<1x128xf32> to vector<1x128xf32>
    %9 = vector.broadcast %8 : vector<1x128xf32> to vector<8x128xf32>
    %c0_8 = arith.constant 0 : index
    %c0_9 = arith.constant 0 : index
    %10 = vector.load %arg4[%c0_8, %c0_9] : memref<2x128xf32, #tpu.memory_space<vmem>>, vector<1x128xf32>
    %11 = vector.shape_cast %10 : vector<1x128xf32> to vector<1x128xf32>
    %12 = vector.broadcast %11 : vector<1x128xf32> to vector<8x128xf32>
    %c1_10 = arith.constant 1 : index
    %c0_11 = arith.constant 0 : index
    %13 = vector.load %arg4[%c1_10, %c0_11] : memref<2x128xf32, #tpu.memory_space<vmem>>, vector<1x128xf32>
    %14 = vector.shape_cast %13 : vector<1x128xf32> to vector<1x128xf32>
    %15 = vector.broadcast %14 : vector<1x128xf32> to vector<8x128xf32>
    %cst_12 = arith.constant 0.000000e+00 : f32
    %16 = vector.broadcast %cst_12 : f32 to vector<8x128xf32>
    %cst_13 = arith.constant 0xFF800000 : f32
    %17 = vector.broadcast %cst_13 : f32 to vector<8x128xf32>
    %c0_i32 = arith.constant 0 : i32
    %c8_i32 = arith.constant 8 : i32
    %18 = arith.muli %c0_i32, %c8_i32 : i32
    %19 = tpu.assume_multiple %18, 8 : i32
    %20 = arith.index_cast %19 : i32 to index
    %c0_14 = arith.constant 0 : index
    %21 = vector.load %arg8[%20, %c0_14] : memref<64x512xf32, #tpu.memory_space<vmem>>, vector<8x512xf32>
    %22 = vector.extract_strided_slice %21 {offsets = [0, 0], sizes = [8, 128], strides = [1, 1]} : vector<8x512xf32> to vector<8x128xf32>
    %23 = vector.extract_strided_slice %21 {offsets = [0, 128], sizes = [8, 128], strides = [1, 1]} : vector<8x512xf32> to vector<8x128xf32>
    %24 = vector.extract_strided_slice %21 {offsets = [0, 256], sizes = [8, 128], strides = [1, 1]} : vector<8x512xf32> to vector<8x128xf32>
    %25 = vector.extract_strided_slice %21 {offsets = [0, 384], sizes = [8, 128], strides = [1, 1]} : vector<8x512xf32> to vector<8x128xf32>
    %26 = arith.mulf %6, %16 : vector<8x128xf32>
    %27 = arith.addf %23, %26 : vector<8x128xf32>
    %28 = arith.addf %27, %12 : vector<8x128xf32>
    %cst_15 = arith.constant -3.000000e+01 : f32
    %29 = vector.broadcast %cst_15 : f32 to vector<8x128xf32>
    %30 = arith.maximumf %28, %29 : vector<8x128xf32>
    %cst_16 = arith.constant 0.000000e+00 : f32
    %31 = vector.broadcast %cst_16 : f32 to vector<8x128xf32>
    %32 = arith.subf %31, %30 : vector<8x128xf32>
    %33 = math.exp %32 : vector<8x128xf32>
    %cst_17 = arith.constant 1.000000e+00 : f32
    %34 = vector.broadcast %cst_17 : f32 to vector<8x128xf32>
    %35 = arith.addf %34, %33 : vector<8x128xf32>
    %36 = tpu.reciprocal %35 {approx = true} : vector<8x128xf32> -> vector<8x128xf32>
    %37 = arith.mulf %35, %36 : vector<8x128xf32>
    %cst_18 = arith.constant 2.000000e+00 : f32
    %38 = vector.broadcast %cst_18 : f32 to vector<8x128xf32>
    %39 = arith.subf %38, %37 : vector<8x128xf32>
    %40 = arith.mulf %36, %39 : vector<8x128xf32>
    %41 = arith.mulf %40, %16 : vector<8x128xf32>
    %cst_19 = arith.constant 1.000000e+00 : f32
    %42 = vector.broadcast %cst_19 : f32 to vector<8x128xf32>
    %43 = arith.subf %42, %40 : vector<8x128xf32>
    %44 = arith.mulf %43, %22 : vector<8x128xf32>
    %45 = arith.addf %41, %44 : vector<8x128xf32>
    %46 = arith.mulf %9, %45 : vector<8x128xf32>
    %47 = arith.addf %24, %46 : vector<8x128xf32>
    %48 = arith.addf %47, %15 : vector<8x128xf32>
    %cst_20 = arith.constant -3.000000e+01 : f32
    %49 = vector.broadcast %cst_20 : f32 to vector<8x128xf32>
    %50 = arith.maximumf %48, %49 : vector<8x128xf32>
    %cst_21 = arith.constant 0.000000e+00 : f32
    %51 = vector.broadcast %cst_21 : f32 to vector<8x128xf32>
    %52 = arith.subf %51, %50 : vector<8x128xf32>
    %53 = math.exp %52 : vector<8x128xf32>
    %cst_22 = arith.constant 1.000000e+00 : f32
    %54 = vector.broadcast %cst_22 : f32 to vector<8x128xf32>
    %55 = arith.addf %54, %53 : vector<8x128xf32>
    %56 = tpu.reciprocal %55 {approx = true} : vector<8x128xf32> -> vector<8x128xf32>
    %57 = arith.mulf %55, %56 : vector<8x128xf32>
    %cst_23 = arith.constant 2.000000e+00 : f32
    %58 = vector.broadcast %cst_23 : f32 to vector<8x128xf32>
    %59 = arith.subf %58, %57 : vector<8x128xf32>
    %60 = arith.mulf %56, %59 : vector<8x128xf32>
    %61 = arith.mulf %60, %45 : vector<8x128xf32>
    %cst_24 = arith.constant 1.000000e+00 : f32
    %62 = vector.broadcast %cst_24 : f32 to vector<8x128xf32>
    %63 = arith.subf %62, %60 : vector<8x128xf32>
    %64 = arith.mulf %63, %25 : vector<8x128xf32>
    %65 = arith.addf %61, %64 : vector<8x128xf32>
    %66 = arith.addf %16, %65 : vector<8x128xf32>
    %67 = arith.maximumf %17, %65 : vector<8x128xf32>
    %c1_i32 = arith.constant 1 : i32
    %c8_i32_25 = arith.constant 8 : i32
    %68 = arith.muli %c1_i32, %c8_i32_25 : i32
    %69 = tpu.assume_multiple %68, 8 : i32
    %70 = arith.index_cast %69 : i32 to index
    %c0_26 = arith.constant 0 : index
    %71 = vector.load %arg8[%70, %c0_26] : memref<64x512xf32, #tpu.memory_space<vmem>>, vector<8x512xf32>
    %72 = vector.extract_strided_slice %71 {offsets = [0, 0], sizes = [8, 128], strides = [1, 1]} : vector<8x512xf32> to vector<8x128xf32>
    %73 = vector.extract_strided_slice %71 {offsets = [0, 128], sizes = [8, 128], strides = [1, 1]} : vector<8x512xf32> to vector<8x128xf32>
    %74 = vector.extract_strided_slice %71 {offsets = [0, 256], sizes = [8, 128], strides = [1, 1]} : vector<8x512xf32> to vector<8x128xf32>
    %75 = vector.extract_strided_slice %71 {offsets = [0, 384], sizes = [8, 128], strides = [1, 1]} : vector<8x512xf32> to vector<8x128xf32>
    %76 = arith.mulf %6, %45 : vector<8x128xf32>
    %77 = arith.addf %73, %76 : vector<8x128xf32>
    %78 = arith.addf %77, %12 : vector<8x128xf32>
    %cst_27 = arith.constant -3.000000e+01 : f32
    %79 = vector.broadcast %cst_27 : f32 to vector<8x128xf32>
    %80 = arith.maximumf %78, %79 : vector<8x128xf32>
    %cst_28 = arith.constant 0.000000e+00 : f32
    %81 = vector.broadcast %cst_28 : f32 to vector<8x128xf32>
    %82 = arith.subf %81, %80 : vector<8x128xf32>
    %83 = math.exp %82 : vector<8x128xf32>
    %cst_29 = arith.constant 1.000000e+00 : f32
    %84 = vector.broadcast %cst_29 : f32 to vector<8x128xf32>
    %85 = arith.addf %84, %83 : vector<8x128xf32>
    %86 = tpu.reciprocal %85 {approx = true} : vector<8x128xf32> -> vector<8x128xf32>
    %87 = arith.mulf %85, %86 : vector<8x128xf32>
    %cst_30 = arith.constant 2.000000e+00 : f32
    %88 = vector.broadcast %cst_30 : f32 to vector<8x128xf32>
    %89 = arith.subf %88, %87 : vector<8x128xf32>
    %90 = arith.mulf %86, %89 : vector<8x128xf32>
    %91 = arith.mulf %90, %45 : vector<8x128xf32>
    %cst_31 = arith.constant 1.000000e+00 : f32
    %92 = vector.broadcast %cst_31 : f32 to vector<8x128xf32>
    %93 = arith.subf %92, %90 : vector<8x128xf32>
    %94 = arith.mulf %93, %72 : vector<8x128xf32>
    %95 = arith.addf %91, %94 : vector<8x128xf32>
    %96 = arith.mulf %9, %95 : vector<8x128xf32>
    %97 = arith.addf %74, %96 : vector<8x128xf32>
    %98 = arith.addf %97, %15 : vector<8x128xf32>
    %cst_32 = arith.constant -3.000000e+01 : f32
    %99 = vector.broadcast %cst_32 : f32 to vector<8x128xf32>
    %100 = arith.maximumf %98, %99 : vector<8x128xf32>
    %cst_33 = arith.constant 0.000000e+00 : f32
    %101 = vector.broadcast %cst_33 : f32 to vector<8x128xf32>
    %102 = arith.subf %101, %100 : vector<8x128xf32>
    %103 = math.exp %102 : vector<8x128xf32>
    %cst_34 = arith.constant 1.000000e+00 : f32
    %104 = vector.broadcast %cst_34 : f32 to vector<8x128xf32>
    %105 = arith.addf %104, %103 : vector<8x128xf32>
    %106 = tpu.reciprocal %105 {approx = true} : vector<8x128xf32> -> vector<8x128xf32>
    %107 = arith.mulf %105, %106 : vector<8x128xf32>
    %cst_35 = arith.constant 2.000000e+00 : f32
    %108 = vector.broadcast %cst_35 : f32 to vector<8x128xf32>
    %109 = arith.subf %108, %107 : vector<8x128xf32>
    %110 = arith.mulf %106, %109 : vector<8x128xf32>
    %111 = arith.mulf %110, %95 : vector<8x128xf32>
    %cst_36 = arith.constant 1.000000e+00 : f32
    %112 = vector.broadcast %cst_36 : f32 to vector<8x128xf32>
    %113 = arith.subf %112, %110 : vector<8x128xf32>
    %114 = arith.mulf %113, %75 : vector<8x128xf32>
    %115 = arith.addf %111, %114 : vector<8x128xf32>
    %116 = arith.addf %66, %115 : vector<8x128xf32>
    %117 = arith.maximumf %67, %115 : vector<8x128xf32>
    %c2_i32 = arith.constant 2 : i32
    %c8_i32_37 = arith.constant 8 : i32
    %118 = arith.muli %c2_i32, %c8_i32_37 : i32
    %119 = tpu.assume_multiple %118, 8 : i32
    %120 = arith.index_cast %119 : i32 to index
    %c0_38 = arith.constant 0 : index
    %121 = vector.load %arg8[%120, %c0_38] : memref<64x512xf32, #tpu.memory_space<vmem>>, vector<8x512xf32>
    %122 = vector.extract_strided_slice %121 {offsets = [0, 0], sizes = [8, 128], strides = [1, 1]} : vector<8x512xf32> to vector<8x128xf32>
    %123 = vector.extract_strided_slice %121 {offsets = [0, 128], sizes = [8, 128], strides = [1, 1]} : vector<8x512xf32> to vector<8x128xf32>
    %124 = vector.extract_strided_slice %121 {offsets = [0, 256], sizes = [8, 128], strides = [1, 1]} : vector<8x512xf32> to vector<8x128xf32>
    %125 = vector.extract_strided_slice %121 {offsets = [0, 384], sizes = [8, 128], strides = [1, 1]} : vector<8x512xf32> to vector<8x128xf32>
    %126 = arith.mulf %6, %95 : vector<8x128xf32>
    %127 = arith.addf %123, %126 : vector<8x128xf32>
    %128 = arith.addf %127, %12 : vector<8x128xf32>
    %cst_39 = arith.constant -3.000000e+01 : f32
    %129 = vector.broadcast %cst_39 : f32 to vector<8x128xf32>
    %130 = arith.maximumf %128, %129 : vector<8x128xf32>
    %cst_40 = arith.constant 0.000000e+00 : f32
    %131 = vector.broadcast %cst_40 : f32 to vector<8x128xf32>
    %132 = arith.subf %131, %130 : vector<8x128xf32>
    %133 = math.exp %132 : vector<8x128xf32>
    %cst_41 = arith.constant 1.000000e+00 : f32
    %134 = vector.broadcast %cst_41 : f32 to vector<8x128xf32>
    %135 = arith.addf %134, %133 : vector<8x128xf32>
    %136 = tpu.reciprocal %135 {approx = true} : vector<8x128xf32> -> vector<8x128xf32>
    %137 = arith.mulf %135, %136 : vector<8x128xf32>
    %cst_42 = arith.constant 2.000000e+00 : f32
    %138 = vector.broadcast %cst_42 : f32 to vector<8x128xf32>
    %139 = arith.subf %138, %137 : vector<8x128xf32>
    %140 = arith.mulf %136, %139 : vector<8x128xf32>
    %141 = arith.mulf %140, %95 : vector<8x128xf32>
    %cst_43 = arith.constant 1.000000e+00 : f32
    %142 = vector.broadcast %cst_43 : f32 to vector<8x128xf32>
    %143 = arith.subf %142, %140 : vector<8x128xf32>
    %144 = arith.mulf %143, %122 : vector<8x128xf32>
    %145 = arith.addf %141, %144 : vector<8x128xf32>
    %146 = arith.mulf %9, %145 : vector<8x128xf32>
    %147 = arith.addf %124, %146 : vector<8x128xf32>
    %148 = arith.addf %147, %15 : vector<8x128xf32>
    %cst_44 = arith.constant -3.000000e+01 : f32
    %149 = vector.broadcast %cst_44 : f32 to vector<8x128xf32>
    %150 = arith.maximumf %148, %149 : vector<8x128xf32>
    %cst_45 = arith.constant 0.000000e+00 : f32
    %151 = vector.broadcast %cst_45 : f32 to vector<8x128xf32>
    %152 = arith.subf %151, %150 : vector<8x128xf32>
    %153 = math.exp %152 : vector<8x128xf32>
    %cst_46 = arith.constant 1.000000e+00 : f32
    %154 = vector.broadcast %cst_46 : f32 to vector<8x128xf32>
    %155 = arith.addf %154, %153 : vector<8x128xf32>
    %156 = tpu.reciprocal %155 {approx = true} : vector<8x128xf32> -> vector<8x128xf32>
    %157 = arith.mulf %155, %156 : vector<8x128xf32>
    %cst_47 = arith.constant 2.000000e+00 : f32
    %158 = vector.broadcast %cst_47 : f32 to vector<8x128xf32>
    %159 = arith.subf %158, %157 : vector<8x128xf32>
    %160 = arith.mulf %156, %159 : vector<8x128xf32>
    %161 = arith.mulf %160, %145 : vector<8x128xf32>
    %cst_48 = arith.constant 1.000000e+00 : f32
    %162 = vector.broadcast %cst_48 : f32 to vector<8x128xf32>
    %163 = arith.subf %162, %160 : vector<8x128xf32>
    %164 = arith.mulf %163, %125 : vector<8x128xf32>
    %165 = arith.addf %161, %164 : vector<8x128xf32>
    %166 = arith.addf %116, %165 : vector<8x128xf32>
    %167 = arith.maximumf %117, %165 : vector<8x128xf32>
    %c3_i32 = arith.constant 3 : i32
    %c8_i32_49 = arith.constant 8 : i32
    %168 = arith.muli %c3_i32, %c8_i32_49 : i32
    %169 = tpu.assume_multiple %168, 8 : i32
    %170 = arith.index_cast %169 : i32 to index
    %c0_50 = arith.constant 0 : index
    %171 = vector.load %arg8[%170, %c0_50] : memref<64x512xf32, #tpu.memory_space<vmem>>, vector<8x512xf32>
    %172 = vector.extract_strided_slice %171 {offsets = [0, 0], sizes = [8, 128], strides = [1, 1]} : vector<8x512xf32> to vector<8x128xf32>
    %173 = vector.extract_strided_slice %171 {offsets = [0, 128], sizes = [8, 128], strides = [1, 1]} : vector<8x512xf32> to vector<8x128xf32>
    %174 = vector.extract_strided_slice %171 {offsets = [0, 256], sizes = [8, 128], strides = [1, 1]} : vector<8x512xf32> to vector<8x128xf32>
    %175 = vector.extract_strided_slice %171 {offsets = [0, 384], sizes = [8, 128], strides = [1, 1]} : vector<8x512xf32> to vector<8x128xf32>
    %176 = arith.mulf %6, %145 : vector<8x128xf32>
    %177 = arith.addf %173, %176 : vector<8x128xf32>
    %178 = arith.addf %177, %12 : vector<8x128xf32>
    %cst_51 = arith.constant -3.000000e+01 : f32
    %179 = vector.broadcast %cst_51 : f32 to vector<8x128xf32>
    %180 = arith.maximumf %178, %179 : vector<8x128xf32>
    %cst_52 = arith.constant 0.000000e+00 : f32
    %181 = vector.broadcast %cst_52 : f32 to vector<8x128xf32>
    %182 = arith.subf %181, %180 : vector<8x128xf32>
    %183 = math.exp %182 : vector<8x128xf32>
    %cst_53 = arith.constant 1.000000e+00 : f32
    %184 = vector.broadcast %cst_53 : f32 to vector<8x128xf32>
    %185 = arith.addf %184, %183 : vector<8x128xf32>
    %186 = tpu.reciprocal %185 {approx = true} : vector<8x128xf32> -> vector<8x128xf32>
    %187 = arith.mulf %185, %186 : vector<8x128xf32>
    %cst_54 = arith.constant 2.000000e+00 : f32
    %188 = vector.broadcast %cst_54 : f32 to vector<8x128xf32>
    %189 = arith.subf %188, %187 : vector<8x128xf32>
    %190 = arith.mulf %186, %189 : vector<8x128xf32>
    %191 = arith.mulf %190, %145 : vector<8x128xf32>
    %cst_55 = arith.constant 1.000000e+00 : f32
    %192 = vector.broadcast %cst_55 : f32 to vector<8x128xf32>
    %193 = arith.subf %192, %190 : vector<8x128xf32>
    %194 = arith.mulf %193, %172 : vector<8x128xf32>
    %195 = arith.addf %191, %194 : vector<8x128xf32>
    %196 = arith.mulf %9, %195 : vector<8x128xf32>
    %197 = arith.addf %174, %196 : vector<8x128xf32>
    %198 = arith.addf %197, %15 : vector<8x128xf32>
    %cst_56 = arith.constant -3.000000e+01 : f32
    %199 = vector.broadcast %cst_56 : f32 to vector<8x128xf32>
    %200 = arith.maximumf %198, %199 : vector<8x128xf32>
    %cst_57 = arith.constant 0.000000e+00 : f32
    %201 = vector.broadcast %cst_57 : f32 to vector<8x128xf32>
    %202 = arith.subf %201, %200 : vector<8x128xf32>
    %203 = math.exp %202 : vector<8x128xf32>
    %cst_58 = arith.constant 1.000000e+00 : f32
    %204 = vector.broadcast %cst_58 : f32 to vector<8x128xf32>
    %205 = arith.addf %204, %203 : vector<8x128xf32>
    %206 = tpu.reciprocal %205 {approx = true} : vector<8x128xf32> -> vector<8x128xf32>
    %207 = arith.mulf %205, %206 : vector<8x128xf32>
    %cst_59 = arith.constant 2.000000e+00 : f32
    %208 = vector.broadcast %cst_59 : f32 to vector<8x128xf32>
    %209 = arith.subf %208, %207 : vector<8x128xf32>
    %210 = arith.mulf %206, %209 : vector<8x128xf32>
    %211 = arith.mulf %210, %195 : vector<8x128xf32>
    %cst_60 = arith.constant 1.000000e+00 : f32
    %212 = vector.broadcast %cst_60 : f32 to vector<8x128xf32>
    %213 = arith.subf %212, %210 : vector<8x128xf32>
    %214 = arith.mulf %213, %175 : vector<8x128xf32>
    %215 = arith.addf %211, %214 : vector<8x128xf32>
    %216 = arith.addf %166, %215 : vector<8x128xf32>
    %217 = arith.maximumf %167, %215 : vector<8x128xf32>
    %c4_i32 = arith.constant 4 : i32
    %c8_i32_61 = arith.constant 8 : i32
    %218 = arith.muli %c4_i32, %c8_i32_61 : i32
    %219 = tpu.assume_multiple %218, 8 : i32
    %220 = arith.index_cast %219 : i32 to index
    %c0_62 = arith.constant 0 : index
    %221 = vector.load %arg8[%220, %c0_62] : memref<64x512xf32, #tpu.memory_space<vmem>>, vector<8x512xf32>
    %222 = vector.extract_strided_slice %221 {offsets = [0, 0], sizes = [8, 128], strides = [1, 1]} : vector<8x512xf32> to vector<8x128xf32>
    %223 = vector.extract_strided_slice %221 {offsets = [0, 128], sizes = [8, 128], strides = [1, 1]} : vector<8x512xf32> to vector<8x128xf32>
    %224 = vector.extract_strided_slice %221 {offsets = [0, 256], sizes = [8, 128], strides = [1, 1]} : vector<8x512xf32> to vector<8x128xf32>
    %225 = vector.extract_strided_slice %221 {offsets = [0, 384], sizes = [8, 128], strides = [1, 1]} : vector<8x512xf32> to vector<8x128xf32>
    %226 = arith.mulf %6, %195 : vector<8x128xf32>
    %227 = arith.addf %223, %226 : vector<8x128xf32>
    %228 = arith.addf %227, %12 : vector<8x128xf32>
    %cst_63 = arith.constant -3.000000e+01 : f32
    %229 = vector.broadcast %cst_63 : f32 to vector<8x128xf32>
    %230 = arith.maximumf %228, %229 : vector<8x128xf32>
    %cst_64 = arith.constant 0.000000e+00 : f32
    %231 = vector.broadcast %cst_64 : f32 to vector<8x128xf32>
    %232 = arith.subf %231, %230 : vector<8x128xf32>
    %233 = math.exp %232 : vector<8x128xf32>
    %cst_65 = arith.constant 1.000000e+00 : f32
    %234 = vector.broadcast %cst_65 : f32 to vector<8x128xf32>
    %235 = arith.addf %234, %233 : vector<8x128xf32>
    %236 = tpu.reciprocal %235 {approx = true} : vector<8x128xf32> -> vector<8x128xf32>
    %237 = arith.mulf %235, %236 : vector<8x128xf32>
    %cst_66 = arith.constant 2.000000e+00 : f32
    %238 = vector.broadcast %cst_66 : f32 to vector<8x128xf32>
    %239 = arith.subf %238, %237 : vector<8x128xf32>
    %240 = arith.mulf %236, %239 : vector<8x128xf32>
    %241 = arith.mulf %240, %195 : vector<8x128xf32>
    %cst_67 = arith.constant 1.000000e+00 : f32
    %242 = vector.broadcast %cst_67 : f32 to vector<8x128xf32>
    %243 = arith.subf %242, %240 : vector<8x128xf32>
    %244 = arith.mulf %243, %222 : vector<8x128xf32>
    %245 = arith.addf %241, %244 : vector<8x128xf32>
    %246 = arith.mulf %9, %245 : vector<8x128xf32>
    %247 = arith.addf %224, %246 : vector<8x128xf32>
    %248 = arith.addf %247, %15 : vector<8x128xf32>
    %cst_68 = arith.constant -3.000000e+01 : f32
    %249 = vector.broadcast %cst_68 : f32 to vector<8x128xf32>
    %250 = arith.maximumf %248, %249 : vector<8x128xf32>
    %cst_69 = arith.constant 0.000000e+00 : f32
    %251 = vector.broadcast %cst_69 : f32 to vector<8x128xf32>
    %252 = arith.subf %251, %250 : vector<8x128xf32>
    %253 = math.exp %252 : vector<8x128xf32>
    %cst_70 = arith.constant 1.000000e+00 : f32
    %254 = vector.broadcast %cst_70 : f32 to vector<8x128xf32>
    %255 = arith.addf %254, %253 : vector<8x128xf32>
    %256 = tpu.reciprocal %255 {approx = true} : vector<8x128xf32> -> vector<8x128xf32>
    %257 = arith.mulf %255, %256 : vector<8x128xf32>
    %cst_71 = arith.constant 2.000000e+00 : f32
    %258 = vector.broadcast %cst_71 : f32 to vector<8x128xf32>
    %259 = arith.subf %258, %257 : vector<8x128xf32>
    %260 = arith.mulf %256, %259 : vector<8x128xf32>
    %261 = arith.mulf %260, %245 : vector<8x128xf32>
    %cst_72 = arith.constant 1.000000e+00 : f32
    %262 = vector.broadcast %cst_72 : f32 to vector<8x128xf32>
    %263 = arith.subf %262, %260 : vector<8x128xf32>
    %264 = arith.mulf %263, %225 : vector<8x128xf32>
    %265 = arith.addf %261, %264 : vector<8x128xf32>
    %266 = arith.addf %216, %265 : vector<8x128xf32>
    %267 = arith.maximumf %217, %265 : vector<8x128xf32>
    %c5_i32 = arith.constant 5 : i32
    %c8_i32_73 = arith.constant 8 : i32
    %268 = arith.muli %c5_i32, %c8_i32_73 : i32
    %269 = tpu.assume_multiple %268, 8 : i32
    %270 = arith.index_cast %269 : i32 to index
    %c0_74 = arith.constant 0 : index
    %271 = vector.load %arg8[%270, %c0_74] : memref<64x512xf32, #tpu.memory_space<vmem>>, vector<8x512xf32>
    %272 = vector.extract_strided_slice %271 {offsets = [0, 0], sizes = [8, 128], strides = [1, 1]} : vector<8x512xf32> to vector<8x128xf32>
    %273 = vector.extract_strided_slice %271 {offsets = [0, 128], sizes = [8, 128], strides = [1, 1]} : vector<8x512xf32> to vector<8x128xf32>
    %274 = vector.extract_strided_slice %271 {offsets = [0, 256], sizes = [8, 128], strides = [1, 1]} : vector<8x512xf32> to vector<8x128xf32>
    %275 = vector.extract_strided_slice %271 {offsets = [0, 384], sizes = [8, 128], strides = [1, 1]} : vector<8x512xf32> to vector<8x128xf32>
    %276 = arith.mulf %6, %245 : vector<8x128xf32>
    %277 = arith.addf %273, %276 : vector<8x128xf32>
    %278 = arith.addf %277, %12 : vector<8x128xf32>
    %cst_75 = arith.constant -3.000000e+01 : f32
    %279 = vector.broadcast %cst_75 : f32 to vector<8x128xf32>
    %280 = arith.maximumf %278, %279 : vector<8x128xf32>
    %cst_76 = arith.constant 0.000000e+00 : f32
    %281 = vector.broadcast %cst_76 : f32 to vector<8x128xf32>
    %282 = arith.subf %281, %280 : vector<8x128xf32>
    %283 = math.exp %282 : vector<8x128xf32>
    %cst_77 = arith.constant 1.000000e+00 : f32
    %284 = vector.broadcast %cst_77 : f32 to vector<8x128xf32>
    %285 = arith.addf %284, %283 : vector<8x128xf32>
    %286 = tpu.reciprocal %285 {approx = true} : vector<8x128xf32> -> vector<8x128xf32>
    %287 = arith.mulf %285, %286 : vector<8x128xf32>
    %cst_78 = arith.constant 2.000000e+00 : f32
    %288 = vector.broadcast %cst_78 : f32 to vector<8x128xf32>
    %289 = arith.subf %288, %287 : vector<8x128xf32>
    %290 = arith.mulf %286, %289 : vector<8x128xf32>
    %291 = arith.mulf %290, %245 : vector<8x128xf32>
    %cst_79 = arith.constant 1.000000e+00 : f32
    %292 = vector.broadcast %cst_79 : f32 to vector<8x128xf32>
    %293 = arith.subf %292, %290 : vector<8x128xf32>
    %294 = arith.mulf %293, %272 : vector<8x128xf32>
    %295 = arith.addf %291, %294 : vector<8x128xf32>
    %296 = arith.mulf %9, %295 : vector<8x128xf32>
    %297 = arith.addf %274, %296 : vector<8x128xf32>
    %298 = arith.addf %297, %15 : vector<8x128xf32>
    %cst_80 = arith.constant -3.000000e+01 : f32
    %299 = vector.broadcast %cst_80 : f32 to vector<8x128xf32>
    %300 = arith.maximumf %298, %299 : vector<8x128xf32>
    %cst_81 = arith.constant 0.000000e+00 : f32
    %301 = vector.broadcast %cst_81 : f32 to vector<8x128xf32>
    %302 = arith.subf %301, %300 : vector<8x128xf32>
    %303 = math.exp %302 : vector<8x128xf32>
    %cst_82 = arith.constant 1.000000e+00 : f32
    %304 = vector.broadcast %cst_82 : f32 to vector<8x128xf32>
    %305 = arith.addf %304, %303 : vector<8x128xf32>
    %306 = tpu.reciprocal %305 {approx = true} : vector<8x128xf32> -> vector<8x128xf32>
    %307 = arith.mulf %305, %306 : vector<8x128xf32>
    %cst_83 = arith.constant 2.000000e+00 : f32
    %308 = vector.broadcast %cst_83 : f32 to vector<8x128xf32>
    %309 = arith.subf %308, %307 : vector<8x128xf32>
    %310 = arith.mulf %306, %309 : vector<8x128xf32>
    %311 = arith.mulf %310, %295 : vector<8x128xf32>
    %cst_84 = arith.constant 1.000000e+00 : f32
    %312 = vector.broadcast %cst_84 : f32 to vector<8x128xf32>
    %313 = arith.subf %312, %310 : vector<8x128xf32>
    %314 = arith.mulf %313, %275 : vector<8x128xf32>
    %315 = arith.addf %311, %314 : vector<8x128xf32>
    %316 = arith.addf %266, %315 : vector<8x128xf32>
    %317 = arith.maximumf %267, %315 : vector<8x128xf32>
    %c6_i32 = arith.constant 6 : i32
    %c8_i32_85 = arith.constant 8 : i32
    %318 = arith.muli %c6_i32, %c8_i32_85 : i32
    %319 = tpu.assume_multiple %318, 8 : i32
    %320 = arith.index_cast %319 : i32 to index
    %c0_86 = arith.constant 0 : index
    %321 = vector.load %arg8[%320, %c0_86] : memref<64x512xf32, #tpu.memory_space<vmem>>, vector<8x512xf32>
    %322 = vector.extract_strided_slice %321 {offsets = [0, 0], sizes = [8, 128], strides = [1, 1]} : vector<8x512xf32> to vector<8x128xf32>
    %323 = vector.extract_strided_slice %321 {offsets = [0, 128], sizes = [8, 128], strides = [1, 1]} : vector<8x512xf32> to vector<8x128xf32>
    %324 = vector.extract_strided_slice %321 {offsets = [0, 256], sizes = [8, 128], strides = [1, 1]} : vector<8x512xf32> to vector<8x128xf32>
    %325 = vector.extract_strided_slice %321 {offsets = [0, 384], sizes = [8, 128], strides = [1, 1]} : vector<8x512xf32> to vector<8x128xf32>
    %326 = arith.mulf %6, %295 : vector<8x128xf32>
    %327 = arith.addf %323, %326 : vector<8x128xf32>
    %328 = arith.addf %327, %12 : vector<8x128xf32>
    %cst_87 = arith.constant -3.000000e+01 : f32
    %329 = vector.broadcast %cst_87 : f32 to vector<8x128xf32>
    %330 = arith.maximumf %328, %329 : vector<8x128xf32>
    %cst_88 = arith.constant 0.000000e+00 : f32
    %331 = vector.broadcast %cst_88 : f32 to vector<8x128xf32>
    %332 = arith.subf %331, %330 : vector<8x128xf32>
    %333 = math.exp %332 : vector<8x128xf32>
    %cst_89 = arith.constant 1.000000e+00 : f32
    %334 = vector.broadcast %cst_89 : f32 to vector<8x128xf32>
    %335 = arith.addf %334, %333 : vector<8x128xf32>
    %336 = tpu.reciprocal %335 {approx = true} : vector<8x128xf32> -> vector<8x128xf32>
    %337 = arith.mulf %335, %336 : vector<8x128xf32>
    %cst_90 = arith.constant 2.000000e+00 : f32
    %338 = vector.broadcast %cst_90 : f32 to vector<8x128xf32>
    %339 = arith.subf %338, %337 : vector<8x128xf32>
    %340 = arith.mulf %336, %339 : vector<8x128xf32>
    %341 = arith.mulf %340, %295 : vector<8x128xf32>
    %cst_91 = arith.constant 1.000000e+00 : f32
    %342 = vector.broadcast %cst_91 : f32 to vector<8x128xf32>
    %343 = arith.subf %342, %340 : vector<8x128xf32>
    %344 = arith.mulf %343, %322 : vector<8x128xf32>
    %345 = arith.addf %341, %344 : vector<8x128xf32>
    %346 = arith.mulf %9, %345 : vector<8x128xf32>
    %347 = arith.addf %324, %346 : vector<8x128xf32>
    %348 = arith.addf %347, %15 : vector<8x128xf32>
    %cst_92 = arith.constant -3.000000e+01 : f32
    %349 = vector.broadcast %cst_92 : f32 to vector<8x128xf32>
    %350 = arith.maximumf %348, %349 : vector<8x128xf32>
    %cst_93 = arith.constant 0.000000e+00 : f32
    %351 = vector.broadcast %cst_93 : f32 to vector<8x128xf32>
    %352 = arith.subf %351, %350 : vector<8x128xf32>
    %353 = math.exp %352 : vector<8x128xf32>
    %cst_94 = arith.constant 1.000000e+00 : f32
    %354 = vector.broadcast %cst_94 : f32 to vector<8x128xf32>
    %355 = arith.addf %354, %353 : vector<8x128xf32>
    %356 = tpu.reciprocal %355 {approx = true} : vector<8x128xf32> -> vector<8x128xf32>
    %357 = arith.mulf %355, %356 : vector<8x128xf32>
    %cst_95 = arith.constant 2.000000e+00 : f32
    %358 = vector.broadcast %cst_95 : f32 to vector<8x128xf32>
    %359 = arith.subf %358, %357 : vector<8x128xf32>
    %360 = arith.mulf %356, %359 : vector<8x128xf32>
    %361 = arith.mulf %360, %345 : vector<8x128xf32>
    %cst_96 = arith.constant 1.000000e+00 : f32
    %362 = vector.broadcast %cst_96 : f32 to vector<8x128xf32>
    %363 = arith.subf %362, %360 : vector<8x128xf32>
    %364 = arith.mulf %363, %325 : vector<8x128xf32>
    %365 = arith.addf %361, %364 : vector<8x128xf32>
    %366 = arith.addf %316, %365 : vector<8x128xf32>
    %367 = arith.maximumf %317, %365 : vector<8x128xf32>
    %c7_i32 = arith.constant 7 : i32
    %c8_i32_97 = arith.constant 8 : i32
    %368 = arith.muli %c7_i32, %c8_i32_97 : i32
    %369 = tpu.assume_multiple %368, 8 : i32
    %370 = arith.index_cast %369 : i32 to index
    %c0_98 = arith.constant 0 : index
    %371 = vector.load %arg8[%370, %c0_98] : memref<64x512xf32, #tpu.memory_space<vmem>>, vector<8x512xf32>
    %372 = vector.extract_strided_slice %371 {offsets = [0, 0], sizes = [8, 128], strides = [1, 1]} : vector<8x512xf32> to vector<8x128xf32>
    %373 = vector.extract_strided_slice %371 {offsets = [0, 128], sizes = [8, 128], strides = [1, 1]} : vector<8x512xf32> to vector<8x128xf32>
    %374 = vector.extract_strided_slice %371 {offsets = [0, 256], sizes = [8, 128], strides = [1, 1]} : vector<8x512xf32> to vector<8x128xf32>
    %375 = vector.extract_strided_slice %371 {offsets = [0, 384], sizes = [8, 128], strides = [1, 1]} : vector<8x512xf32> to vector<8x128xf32>
    %376 = arith.mulf %6, %345 : vector<8x128xf32>
    %377 = arith.addf %373, %376 : vector<8x128xf32>
    %378 = arith.addf %377, %12 : vector<8x128xf32>
    %cst_99 = arith.constant -3.000000e+01 : f32
    %379 = vector.broadcast %cst_99 : f32 to vector<8x128xf32>
    %380 = arith.maximumf %378, %379 : vector<8x128xf32>
    %cst_100 = arith.constant 0.000000e+00 : f32
    %381 = vector.broadcast %cst_100 : f32 to vector<8x128xf32>
    %382 = arith.subf %381, %380 : vector<8x128xf32>
    %383 = math.exp %382 : vector<8x128xf32>
    %cst_101 = arith.constant 1.000000e+00 : f32
    %384 = vector.broadcast %cst_101 : f32 to vector<8x128xf32>
    %385 = arith.addf %384, %383 : vector<8x128xf32>
    %386 = tpu.reciprocal %385 {approx = true} : vector<8x128xf32> -> vector<8x128xf32>
    %387 = arith.mulf %385, %386 : vector<8x128xf32>
    %cst_102 = arith.constant 2.000000e+00 : f32
    %388 = vector.broadcast %cst_102 : f32 to vector<8x128xf32>
    %389 = arith.subf %388, %387 : vector<8x128xf32>
    %390 = arith.mulf %386, %389 : vector<8x128xf32>
    %391 = arith.mulf %390, %345 : vector<8x128xf32>
    %cst_103 = arith.constant 1.000000e+00 : f32
    %392 = vector.broadcast %cst_103 : f32 to vector<8x128xf32>
    %393 = arith.subf %392, %390 : vector<8x128xf32>
    %394 = arith.mulf %393, %372 : vector<8x128xf32>
    %395 = arith.addf %391, %394 : vector<8x128xf32>
    %396 = arith.mulf %9, %395 : vector<8x128xf32>
    %397 = arith.addf %374, %396 : vector<8x128xf32>
    %398 = arith.addf %397, %15 : vector<8x128xf32>
    %cst_104 = arith.constant -3.000000e+01 : f32
    %399 = vector.broadcast %cst_104 : f32 to vector<8x128xf32>
    %400 = arith.maximumf %398, %399 : vector<8x128xf32>
    %cst_105 = arith.constant 0.000000e+00 : f32
    %401 = vector.broadcast %cst_105 : f32 to vector<8x128xf32>
    %402 = arith.subf %401, %400 : vector<8x128xf32>
    %403 = math.exp %402 : vector<8x128xf32>
    %cst_106 = arith.constant 1.000000e+00 : f32
    %404 = vector.broadcast %cst_106 : f32 to vector<8x128xf32>
    %405 = arith.addf %404, %403 : vector<8x128xf32>
    %406 = tpu.reciprocal %405 {approx = true} : vector<8x128xf32> -> vector<8x128xf32>
    %407 = arith.mulf %405, %406 : vector<8x128xf32>
    %cst_107 = arith.constant 2.000000e+00 : f32
    %408 = vector.broadcast %cst_107 : f32 to vector<8x128xf32>
    %409 = arith.subf %408, %407 : vector<8x128xf32>
    %410 = arith.mulf %406, %409 : vector<8x128xf32>
    %411 = arith.mulf %410, %395 : vector<8x128xf32>
    %cst_108 = arith.constant 1.000000e+00 : f32
    %412 = vector.broadcast %cst_108 : f32 to vector<8x128xf32>
    %413 = arith.subf %412, %410 : vector<8x128xf32>
    %414 = arith.mulf %413, %375 : vector<8x128xf32>
    %415 = arith.addf %411, %414 : vector<8x128xf32>
    %416 = arith.addf %366, %415 : vector<8x128xf32>
    %417 = arith.maximumf %367, %415 : vector<8x128xf32>
    %c8_i32_109 = arith.constant 8 : i32
    %c0_110 = arith.constant 0 : index
    %c0_111 = arith.constant 0 : index
    %418 = vector.load %arg5[%c0_110, %c0_111] : memref<2x128xf32, #tpu.memory_space<vmem>>, vector<1x128xf32>
    %419 = vector.shape_cast %418 : vector<1x128xf32> to vector<1x128xf32>
    %420 = vector.broadcast %419 : vector<1x128xf32> to vector<8x128xf32>
    %c1_112 = arith.constant 1 : index
    %c0_113 = arith.constant 0 : index
    %421 = vector.load %arg5[%c1_112, %c0_113] : memref<2x128xf32, #tpu.memory_space<vmem>>, vector<1x128xf32>
    %422 = vector.shape_cast %421 : vector<1x128xf32> to vector<1x128xf32>
    %423 = vector.broadcast %422 : vector<1x128xf32> to vector<8x128xf32>
    %cst_114 = arith.constant 1.250000e-01 : f32
    %424 = vector.broadcast %cst_114 : f32 to vector<8x128xf32>
    %425 = arith.mulf %416, %424 : vector<8x128xf32>
    %426 = arith.mulf %425, %420 : vector<8x128xf32>
    %427 = arith.mulf %417, %423 : vector<8x128xf32>
    %428 = arith.addf %426, %427 : vector<8x128xf32>
    %cst_115 = arith.constant dense<0.000000e+00> : vector<8xf32>
    %429 = vector.multi_reduction <add>, %428, %cst_115 [1] : vector<8x128xf32> to vector<8xf32>
    %430 = vector.shape_cast %429 : vector<8xf32> to vector<8x1xf32>
    %c0_116 = arith.constant 0 : index
    %c0_117 = arith.constant 0 : index
    %431 = vector.load %arg6[%c0_116, %c0_117] : memref<1x1xf32, #tpu.memory_space<vmem>>, vector<1x1xf32>
    %432 = vector.broadcast %431 : vector<1x1xf32> to vector<8x1xf32>
    %433 = arith.addf %430, %432 : vector<8x1xf32>
    %434 = arith.negf %433 : vector<8x1xf32>
    %435 = math.exp %434 : vector<8x1xf32>
    %cst_118 = arith.constant 1.000000e+00 : f32
    %436 = vector.broadcast %cst_118 : f32 to vector<8x1xf32>
    %437 = arith.addf %436, %435 : vector<8x1xf32>
    %438 = arith.divf %436, %437 : vector<8x1xf32>
    %439 = vector.shape_cast %438 : vector<8x1xf32> to vector<8x1xf32>
    %440 = vector.broadcast %439 : vector<8x1xf32> to vector<8x128xf32>
    %c0_119 = arith.constant 0 : index
    %c0_120 = arith.constant 0 : index
    %441 = vector.load %arg7[%c0_119, %c0_120] : memref<8x128xf32, #tpu.memory_space<vmem>>, vector<8x128xf32>
    tpu.vector_store %arg7[%c0_119, %c0_120], %440 {strides = array<i32>} : memref<8x128xf32, #tpu.memory_space<vmem>>, vector<8x128xf32>,
    return
  }
  func.func @transform_0(%arg0: i32) -> (i32, i32) {
    %c0_i32 = arith.constant 0 : i32
    %c0_i32_0 = arith.constant 0 : i32
    return %arg0, %c0_i32 : i32, i32
  }
  func.func @transform_1(%arg0: i32) -> (i32, i32) {
    %c0_i32 = arith.constant 0 : i32
    %c0_i32_0 = arith.constant 0 : i32
    %c0_i32_1 = arith.constant 0 : i32
    return %c0_i32, %c0_i32_0 : i32, i32
  }
  func.func @transform_2(%arg0: i32) -> (i32, i32) {
    %c0_i32 = arith.constant 0 : i32
    %c0_i32_0 = arith.constant 0 : i32
    %c0_i32_1 = arith.constant 0 : i32
    return %c0_i32, %c0_i32_0 : i32, i32
  }
  func.func @transform_3(%arg0: i32) -> (i32, i32) {
    %c0_i32 = arith.constant 0 : i32
    %c0_i32_0 = arith.constant 0 : i32
    %c0_i32_1 = arith.constant 0 : i32
    return %c0_i32, %c0_i32_0 : i32, i32
  }
  func.func @transform_4(%arg0: i32) -> (i32, i32) {
    %c0_i32 = arith.constant 0 : i32
    %c0_i32_0 = arith.constant 0 : i32
    %c0_i32_1 = arith.constant 0 : i32
    return %c0_i32, %c0_i32_0 : i32, i32
  }
  func.func @transform_5(%arg0: i32) -> (i32, i32) {
    %c0_i32 = arith.constant 0 : i32
    %c0_i32_0 = arith.constant 0 : i32
    %c0_i32_1 = arith.constant 0 : i32
    return %c0_i32, %c0_i32_0 : i32, i32
  }
  func.func @transform_6(%arg0: i32) -> (i32, i32) {
    %c0_i32 = arith.constant 0 : i32
    %c0_i32_0 = arith.constant 0 : i32
    return %arg0, %c0_i32 : i32, i32
  }
}

</mosaic_0001>

<bundles_post_ra>
// kernel: tpu_custom_call.1
= control target key start
LH: loop header
LB: loop body
LE: loop exit
PB: predicated region body
PF: predicated region fallthrough
CT: control target
= control target key end

     0   :  { %s1118_s0 = inlined_call_operand.vmem [shape: bf16[64,32], index: 0, kind: input, shape index: {}]   ;;  %s1119_s1 = inlined_call_operand.hbm [shape: bf16[32,512], index: 1, kind: input, shape index: {}]   ;;  %s1120_s2 = inlined_call_operand.vmem [shape: f32[2,128], index: 2, kind: input, shape index: {}]   ;;  %s1121_s3 = inlined_call_operand.vmem [shape: f32[2,128], index: 3, kind: input, shape index: {}]   ;;  %s1122_s4 = inlined_call_operand.vmem [shape: f32[2,128], index: 4, kind: input, shape index: {}]   ;;  %s1123_s5 = inlined_call_operand.<no memory space> [shape: f32[1,1], index: 5, kind: input, shape index: {}]   ;;  %s1124_s6 = inlined_call_operand.hbm [shape: f32[8,128], index: 6, kind: output, shape index: {}]  }
   0x1   :  { %v11_v0 = vstv %s1123_s5 }
   0x2   :  { %12 = vst [vmem:[#allocation3] sm:$0x1] %v11_v0 }
   0x3   :  { %13 = vsyncpa [#allocation5], 0 }
   0x4   :  { %14 = vsyncpa [#allocation6], 0  ;;  %s879_s23 = smov [#allocation4]   ;;  %s831_s27 = scalar_lea.hbm %s1119_s1, 1024 }
   0x5   :  { %s22_s24 = sshll.u32 %s879_s23, 4  ;;  %p832_p0 = scmp.ne.s32.totalorder %s1119_s1, %s831_s27  ;;  %s23_s24 = int_to_ptr.vmem [resolvable:$true] %s22_s24 }
   0x6   :  { %p835_p1 = scmp.lt.u32.totalorder %s831_s27, %s1119_s1 }
   0x8   :  { %p837_p2 = pnand %p835_p1, %p832_p0 }
   0xa   :  { %840 = shalt.err (!%p837_p2)
}
   0xb   :  { %s841_s5 = scalar_lea.vmem %s23_s24, 1024  ;;  %p846_p4 = scmp.lt.s32.totalorder %s23_s24, %s23_s24 }
   0xc   :  { %p842_p3 = scmp.ne.s32.totalorder %s23_s24, %s841_s5  ;;  %p847_p5 = scmp.lt.s32.totalorder %s841_s5, %s841_s5 }
   0xe   :  { %p848_p6 = por %p847_p5, %p846_p4 }
  0x10   :  { %p849_p7 = pnand %p848_p6, %p842_p3 }
  0x12   :  { %852 = shalt.err (!%p849_p7)
}
  0x13   :  { %s880_s8 = smov 256   ;;  %s881_s9 = smov 16  }
  0x14   :  { %28 = dma.hbm_to_vmem [thread:$0]  %s1119_s1, 1024, %s23_s24, [#allocation5], %s880_s8, %s880_s8, %s881_s9  }
  0x15   :  { %875 = dma.done.wait [#allocation5], 1024  }
  0x16   :  { %876 = vsyncadd [#allocation5], 4294966272  ;;  %v882_v1 = vmov 0   ;;  %v747_v2 = vld [vmem:[#allocation4 + $0x4] ss:$16 sps:$4 sm:$0xff]   ;;  %vm117_vm0 = vcmask 261120  }
  0x17   :  { %162 = vmatprep.mubr.bf16.mxu0 %v882_v1  ;;  %235 = vmatprep.mubr.bf16.mxu1 %v882_v1  ;;  %v749_v3 = vld [vmem:[#allocation4] ss:$16 sps:$4 sm:$0xff]   ;;  %v750_v4 = vld [vmem:[#allocation4 + $0x24] ss:$16 sps:$4 sm:$0xff]   ;;  %v754_v6 = vld [vmem:[#allocation4 + $0xc] ss:$16 sps:$4 sm:$0xff]  }
  0x18   :  { %746 = vset.pattern.permute.xlu0 %v882_v1  ;;  %130 = vmatprep.subr.bf16.mxu0 %v747_v2  ;;  %v752_v5 = vld [vmem:[#allocation4 + $0x20] ss:$16 sps:$4 sm:$0xff]   ;;  %v756_v7 = vld [vmem:[#allocation4 + $0x8] ss:$16 sps:$4 sm:$0xff]   ;;  %v757_v8 = vld [vmem:[#allocation4 + $0x2c] ss:$16 sps:$4 sm:$0xff]  }
  0x19   :  { %131 = vmatpush1.bf16.msra.mxu0 %v749_v3  ;;  %v753_v9 = vld [vmem:[%s1118_s0] sm:$0xff]   ;;  %203 = vmatprep.subr.bf16.mxu1 %v754_v6  ;;  %v759_v10 = vld [vmem:[#allocation4 + $0x28] ss:$16 sps:$4 sm:$0xff]   ;;  %v761_v12 = vld [vmem:[%s1118_s0 + $0x10] sm:$0xff]   ;;  %s883_s28 = smov [#allocation7]  }
  0x1a   :  { %132 = vmatprep.subr.bf16.mxu0 %v750_v4  ;;  %204 = vmatpush1.bf16.msra.mxu1 %v756_v7  ;;  %v760_v11 = vld [vmem:[%s1118_s0 + $0x8] sm:$0xff]   ;;  %v762_v13 = vld [vmem:[%s1118_s0 + $0x18] sm:$0xff]   ;;  %v957_v14 = vld [vmem:[%s1120_s2] ss:$0 sm:$0xff]  ;;  %s697_s29 = sshll.u32 %s883_s28, 4  ;;  %s698_s29 = int_to_ptr.vmem [resolvable:$true] %s697_s29 }
  0x1b   :  { %205 = vmatprep.subr.bf16.mxu1 %v757_v8  ;;  %v335_v15 = vmul.f32 0.0, %v957_v14  ;;  %v963_v18 = vld [vmem:[%s1121_s3] ss:$0 sm:$0xff]  ;;  %v987_v44 = vld [vmem:[%s1120_s2 + $0x1] ss:$0 sm:$0xff]  ;;  %p858_p9 = scmp.lt.s32.totalorder %s698_s29, %s698_s29 }
  0x1c   :  { %v994_v48 = vld [vmem:[%s1121_s3 + $0x1] ss:$0 sm:$0xff] }
  0x1d   :  { %133 = vmatpush1.bf16.msra.mxu0 %v752_v5 }
  0x1e   :  { %206 = vmatpush1.bf16.msra.mxu1 %v759_v10 }
  0x20   :  { %725 = vmatmul.mubr.msk.bf16.vlgmr.msra.gmra.mrb[0].mxu0 %vm117_vm0, %v753_v9 }
  0x21   :  { %172 = vmatprep.mubr.bf16.mxu0 %v882_v1  ;;  %729 = vmatmul.mubr.msk.bf16.vlgmr.msra.gmra.mrb[0].mxu1 %vm117_vm0, %v753_v9 }
  0x22   :  { %245 = vmatprep.mubr.bf16.mxu1 %v882_v1 }
  0x28   :  { %726 = vmatmul.mubr.msk.bf16.gmra.mrb[4].mxu0 %vm117_vm0, %v760_v11 }
  0x29   :  { %182 = vmatprep.mubr.bf16.mxu0 %v882_v1  ;;  %730 = vmatmul.mubr.msk.bf16.gmra.mrb[4].mxu1 %vm117_vm0, %v760_v11 }
  0x2a   :  { %255 = vmatprep.mubr.bf16.mxu1 %v882_v1 }
  0x30   :  { %727 = vmatmul.mubr.msk.bf16.gmra.mrb[8].mxu0 %vm117_vm0, %v761_v12 }
  0x31   :  { %192 = vmatprep.mubr.bf16.mxu0 %v882_v1  ;;  %731 = vmatmul.mubr.msk.bf16.gmra.mrb[8].mxu1 %vm117_vm0, %v761_v12 }
  0x32   :  { %265 = vmatprep.mubr.bf16.mxu1 %v882_v1 }
  0x38   :  { %728 = vmatmul.mubr.msk.bf16.gmra.mrb[12].mxu0 %vm117_vm0, %v762_v13 }
  0x39   :  { %732 = vmatmul.mubr.msk.bf16.gmra.mrb[12].mxu1 %vm117_vm0, %v762_v13 }
  0xf3   :  { %v164_v16 = vpop.f32.mrb[0].mxu0 }
  0xf4   :  { %v166_v17 = vpop.f32.mrb[1].mxu0  ;;  %v237_v23 = vpop.f32.mrb[0].mxu1 }
  0xf5   :  { %v336_v19 = vadd.f32 %v335_v15, %v166_v17  ;;  %v965_v20 = vpop.f32.mrb[2].mxu0  ;;  %v968_v24 = vpop.f32.mrb[1].mxu1 }
  0xf6   :  { %v170_v21 = vpop.f32.mrb[3].mxu0  ;;  %v970_v26 = vpop.f32.mrb[2].mxu1 }
  0xf7   :  { %v337_v22 = vadd.f32 %v963_v18, %v336_v19  ;;  %v980_v33 = vpop.f32.mrb[3].mxu1 }
  0xf9   :  { %v338_v25 = vmax.f32 %v337_v22, -30.0 }
  0xfb   :  { %v339_v27 = vsub.f32 0.0, %v338_v25  ;;  %v972_v28 = vpop.f32.mrb[4].mxu0 }
  0xfc   :  { %v974_v29 = vpop.f32.mrb[5].mxu0  ;;  %v982_v34 = vpop.f32.mrb[4].mxu1 }
  0xfd   :  { %v340_v30 = vmul.f32 1.442695, %v339_v27  ;;  %v976_v31 = vpop.f32.mrb[6].mxu0  ;;  %v998_v59 = vpop.f32.mrb[5].mxu1 }
  0xfe   :  { %v978_v32 = vpop.f32.mrb[7].mxu0  ;;  %v1008_v0 = vpop.f32.mrb[6].mxu1 }
  0xff   :  { %763 = vpow2.f32 %v340_v30 }
 0x103   :  { %v1000_v60 = vpop.f32.mrb[8].mxu0 }
 0x104   :  { %v1002_v61 = vpop.f32.mrb[9].mxu0 }
 0x105   :  { %v1004_v62 = vpop.f32.mrb[10].mxu0 }
 0x106   :  { %v1006_v63 = vpop.f32.mrb[11].mxu0 }
 0x109   :  { %v764_v35 = vpop.eup %763 }
 0x10a   :  { %v342_v36 = vadd.f32 1.0, %v764_v35 }
 0x10c   :  { %765 = vrcp.f32 %v342_v36 }
 0x116   :  { %v766_v37 = vpop.eup %765 }
 0x117   :  { %v344_v38 = vmul.f32 %v766_v37, %v342_v36 }
 0x119   :  { %v345_v39 = vsub.f32 2.0, %v344_v38 }
 0x11b   :  { %v346_v40 = vmul.f32 %v766_v37, %v345_v39 }
 0x11d   :  { %v348_v41 = vsub.f32 1.0, %v346_v40  ;;  %v347_v42 = vmul.f32 0.0, %v346_v40 }
 0x11f   :  { %v349_v43 = vmul.f32 %v348_v41, %v164_v16 }
 0x121   :  { %v350_v45 = vadd.f32 %v349_v43, %v347_v42  ;;  %v1020_v42 = vpop.f32.mrb[7].mxu1 }
 0x122   :  { %v1022_v43 = vpop.f32.mrb[8].mxu1 }
 0x123   :  { %v375_v46 = vmul.f32 %v957_v14, %v350_v45  ;;  %v351_v47 = vmul.f32 %v987_v44, %v350_v45 }
 0x125   :  { %v376_v49 = vadd.f32 %v375_v46, %v170_v21  ;;  %v352_v50 = vadd.f32 %v351_v47, %v237_v23 }
 0x127   :  { %v377_v51 = vadd.f32 %v963_v18, %v376_v49  ;;  %v353_v52 = vadd.f32 %v994_v48, %v352_v50 }
 0x129   :  { %v378_v53 = vmax.f32 %v377_v51, -30.0  ;;  %v354_v54 = vmax.f32 %v353_v52, -30.0 }
 0x12b   :  { %v379_v55 = vsub.f32 0.0, %v378_v53  ;;  %v355_v56 = vsub.f32 0.0, %v354_v54 }
 0x12d   :  { %v380_v57 = vmul.f32 1.442695, %v379_v55  ;;  %v356_v58 = vmul.f32 1.442695, %v355_v56 }
 0x12f   :  { %767 = vpow2.f32 %v380_v57 }
 0x130   :  { %769 = vpow2.f32 %v356_v58 }
 0x139   :  { %v768_v1 = vpop.eup %767 }
 0x13a   :  { %v770_v2 = vpop.eup %769  ;;  %v382_v3 = vadd.f32 1.0, %v768_v1 }
 0x13b   :  { %v358_v4 = vadd.f32 1.0, %v770_v2 }
 0x13c   :  { %771 = vrcp.f32 %v382_v3 }
 0x13d   :  { %773 = vrcp.f32 %v358_v4 }
 0x146   :  { %v772_v5 = vpop.eup %771 }
 0x147   :  { %v774_v6 = vpop.eup %773  ;;  %v384_v7 = vmul.f32 %v772_v5, %v382_v3 }
 0x148   :  { %v360_v8 = vmul.f32 %v774_v6, %v358_v4 }
 0x149   :  { %v385_v9 = vsub.f32 2.0, %v384_v7 }
 0x14a   :  { %v361_v10 = vsub.f32 2.0, %v360_v8 }
 0x14b   :  { %v386_v11 = vmul.f32 %v772_v5, %v385_v9 }
 0x14c   :  { %v362_v12 = vmul.f32 %v774_v6, %v361_v10 }
 0x14d   :  { %v388_v13 = vsub.f32 1.0, %v386_v11  ;;  %v387_v15 = vmul.f32 %v386_v11, %v350_v45 }
 0x14e   :  { %v363_v16 = vmul.f32 %v362_v12, %v350_v45  ;;  %v364_v17 = vsub.f32 1.0, %v362_v12 }
 0x14f   :  { %v389_v19 = vmul.f32 %v388_v13, %v965_v20 }
 0x150   :  { %v365_v21 = vmul.f32 %v364_v17, %v968_v24 }
 0x151   :  { %v390_v22 = vadd.f32 %v389_v19, %v387_v15 }
 0x152   :  { %v1012_v23 = vadd.f32 %v365_v21, %v363_v16  ;;  %v1034_v21 = vpop.f32.mrb[9].mxu1 }
 0x153   :  { %v416_v25 = vmul.f32 %v957_v14, %v390_v22  ;;  %v391_v27 = vmul.f32 %v987_v44, %v390_v22 }
 0x155   :  { %v417_v30 = vadd.f32 %v416_v25, %v974_v29  ;;  %v392_v35 = vadd.f32 %v391_v27, %v970_v26  ;;  %v1044_v25 = vpop.f32.mrb[10].mxu1 }
 0x157   :  { %v418_v36 = vadd.f32 %v963_v18, %v417_v30  ;;  %v393_v37 = vadd.f32 %v994_v48, %v392_v35 }
 0x159   :  { %v419_v38 = vmax.f32 %v418_v36, -30.0  ;;  %v394_v39 = vmax.f32 %v393_v37, -30.0 }
 0x15b   :  { %v420_v20 = vsub.f32 0.0, %v419_v38  ;;  %v395_v40 = vsub.f32 0.0, %v394_v39 }
 0x15d   :  { %v421_v24 = vmul.f32 1.442695, %v420_v20  ;;  %v396_v41 = vmul.f32 1.442695, %v395_v40 }
 0x15f   :  { %775 = vpow2.f32 %v421_v24 }
 0x160   :  { %777 = vpow2.f32 %v396_v41 }
 0x169   :  { %v776_v45 = vpop.eup %775 }
 0x16a   :  { %v778_v29 = vpop.eup %777  ;;  %v423_v46 = vadd.f32 1.0, %v776_v45 }
 0x16b   :  { %v398_v26 = vadd.f32 1.0, %v778_v29 }
 0x16c   :  { %779 = vrcp.f32 %v423_v46 }
 0x16d   :  { %781 = vrcp.f32 %v398_v26 }
 0x176   :  { %v780_v47 = vpop.eup %779 }
 0x177   :  { %v782_v49 = vpop.eup %781  ;;  %v425_v50 = vmul.f32 %v780_v47, %v423_v46 }
 0x178   :  { %v400_v51 = vmul.f32 %v782_v49, %v398_v26 }
 0x179   :  { %v426_v52 = vsub.f32 2.0, %v425_v50 }
 0x17a   :  { %v401_v53 = vsub.f32 2.0, %v400_v51 }
 0x17b   :  { %v427_v54 = vmul.f32 %v780_v47, %v426_v52 }
 0x17c   :  { %v402_v55 = vmul.f32 %v782_v49, %v401_v53 }
 0x17d   :  { %v429_v56 = vsub.f32 1.0, %v427_v54  ;;  %v428_v57 = vmul.f32 %v427_v54, %v390_v22 }
 0x17e   :  { %v403_v58 = vmul.f32 %v402_v55, %v390_v22  ;;  %v404_v1 = vsub.f32 1.0, %v402_v55  ;;  %v1036_v22 = vpop.f32.mrb[12].mxu0 }
 0x17f   :  { %v430_v2 = vmul.f32 %v429_v56, %v972_v28 }
 0x180   :  { %v405_v3 = vmul.f32 %v404_v1, %v980_v33 }
 0x181   :  { %v431_v4 = vadd.f32 %v430_v2, %v428_v57 }
 0x182   :  { %v406_v5 = vadd.f32 %v405_v3, %v403_v58 }
 0x183   :  { %v457_v6 = vmul.f32 %v957_v14, %v431_v4  ;;  %v432_v7 = vmul.f32 %v987_v44, %v431_v4 }
 0x184   :  { %v407_v8 = vadd.f32 %v406_v5, %v1012_v23  ;;  %v408_v9 = vmax.f32 %v1012_v23, %v406_v5  ;;  %v1038_v23 = vpop.f32.mrb[13].mxu0 }
 0x185   :  { %v458_v10 = vadd.f32 %v457_v6, %v978_v32  ;;  %v433_v11 = vadd.f32 %v432_v7, %v982_v34  ;;  %v1040_v32 = vpop.f32.mrb[14].mxu0  ;;  %v1056_v7 = vpop.f32.mrb[11].mxu1 }
 0x186   :  { %v1042_v34 = vpop.f32.mrb[15].mxu0 }
 0x187   :  { %v459_v12 = vadd.f32 %v963_v18, %v458_v10  ;;  %v434_v28 = vadd.f32 %v994_v48, %v433_v11 }
 0x189   :  { %v460_v13 = vmax.f32 %v459_v12, -30.0  ;;  %v435_v33 = vmax.f32 %v434_v28, -30.0 }
 0x18b   :  { %v461_v15 = vsub.f32 0.0, %v460_v13  ;;  %v436_v16 = vsub.f32 0.0, %v435_v33 }
 0x18d   :  { %v462_v17 = vmul.f32 1.442695, %v461_v15  ;;  %v437_v19 = vmul.f32 1.442695, %v436_v16 }
 0x18f   :  { %783 = vpow2.f32 %v462_v17 }
 0x190   :  { %785 = vpow2.f32 %v437_v19 }
 0x199   :  { %v784_v27 = vpop.eup %783 }
 0x19a   :  { %v786_v30 = vpop.eup %785  ;;  %v464_v35 = vadd.f32 1.0, %v784_v27 }
 0x19b   :  { %v439_v36 = vadd.f32 1.0, %v786_v30 }
 0x19c   :  { %787 = vrcp.f32 %v464_v35 }
 0x19d   :  { %789 = vrcp.f32 %v439_v36 }
 0x1a6   :  { %v788_v37 = vpop.eup %787 }
 0x1a7   :  { %v790_v38 = vpop.eup %789  ;;  %v466_v39 = vmul.f32 %v788_v37, %v464_v35 }
 0x1a8   :  { %v441_v20 = vmul.f32 %v790_v38, %v439_v36 }
 0x1a9   :  { %v467_v40 = vsub.f32 2.0, %v466_v39 }
 0x1aa   :  { %v442_v24 = vsub.f32 2.0, %v441_v20 }
 0x1ab   :  { %v468_v41 = vmul.f32 %v788_v37, %v467_v40 }
 0x1ac   :  { %v443_v45 = vmul.f32 %v790_v38, %v442_v24 }
 0x1ad   :  { %v470_v29 = vsub.f32 1.0, %v468_v41  ;;  %v469_v46 = vmul.f32 %v468_v41, %v431_v4 }
 0x1ae   :  { %v444_v26 = vmul.f32 %v443_v45, %v431_v4  ;;  %v445_v47 = vsub.f32 1.0, %v443_v45 }
 0x1af   :  { %v471_v49 = vmul.f32 %v470_v29, %v976_v31 }
 0x1b0   :  { %v446_v50 = vmul.f32 %v445_v47, %v998_v59 }
 0x1b1   :  { %v472_v51 = vadd.f32 %v471_v49, %v469_v46 }
 0x1b2   :  { %v447_v52 = vadd.f32 %v446_v50, %v444_v26 }
 0x1b3   :  { %v498_v53 = vmul.f32 %v957_v14, %v472_v51  ;;  %v473_v54 = vmul.f32 %v987_v44, %v472_v51 }
 0x1b4   :  { %v448_v55 = vadd.f32 %v447_v52, %v407_v8  ;;  %v1050_v56 = vmax.f32 %v408_v9, %v447_v52  ;;  %v1058_v8 = vpop.f32.mrb[12].mxu1 }
 0x1b5   :  { %v499_v57 = vadd.f32 %v498_v53, %v1002_v61  ;;  %v474_v58 = vadd.f32 %v473_v54, %v1008_v0 }
 0x1b7   :  { %v500_v1 = vadd.f32 %v963_v18, %v499_v57  ;;  %v475_v2 = vadd.f32 %v994_v48, %v474_v58 }
 0x1b9   :  { %v501_v31 = vmax.f32 %v500_v1, -30.0  ;;  %v476_v3 = vmax.f32 %v475_v2, -30.0 }
 0x1bb   :  { %v502_v59 = vsub.f32 0.0, %v501_v31  ;;  %v477_v4 = vsub.f32 0.0, %v476_v3 }
 0x1bd   :  { %v503_v5 = vmul.f32 1.442695, %v502_v59  ;;  %v478_v6 = vmul.f32 1.442695, %v477_v4 }
 0x1bf   :  { %791 = vpow2.f32 %v503_v5 }
 0x1c0   :  { %793 = vpow2.f32 %v478_v6 }
 0x1c9   :  { %v792_v9 = vpop.eup %791 }
 0x1ca   :  { %v794_v61 = vpop.eup %793  ;;  %v505_v10 = vadd.f32 1.0, %v792_v9 }
 0x1cb   :  { %v480_v0 = vadd.f32 1.0, %v794_v61 }
 0x1cc   :  { %795 = vrcp.f32 %v505_v10 }
 0x1cd   :  { %797 = vrcp.f32 %v480_v0 }
 0x1d6   :  { %v796_v11 = vpop.eup %795 }
 0x1d7   :  { %v798_v12 = vpop.eup %797  ;;  %v507_v28 = vmul.f32 %v796_v11, %v505_v10 }
 0x1d8   :  { %v482_v13 = vmul.f32 %v798_v12, %v480_v0 }
 0x1d9   :  { %v508_v33 = vsub.f32 2.0, %v507_v28 }
 0x1da   :  { %v483_v15 = vsub.f32 2.0, %v482_v13 }
 0x1db   :  { %v509_v16 = vmul.f32 %v796_v11, %v508_v33 }
 0x1dc   :  { %v484_v17 = vmul.f32 %v798_v12, %v483_v15 }
 0x1dd   :  { %v511_v19 = vsub.f32 1.0, %v509_v16  ;;  %v510_v27 = vmul.f32 %v509_v16, %v472_v51 }
 0x1de   :  { %v485_v30 = vmul.f32 %v484_v17, %v472_v51  ;;  %v486_v35 = vsub.f32 1.0, %v484_v17 }
 0x1df   :  { %v512_v36 = vmul.f32 %v511_v19, %v1000_v60 }
 0x1e0   :  { %v487_v37 = vmul.f32 %v486_v35, %v1020_v42  ;;  %v1069_v42 = vpop.f32.mrb[13].mxu1 }
 0x1e1   :  { %v513_v38 = vadd.f32 %v512_v36, %v510_v27  ;;  %v1071_v53 = vpop.f32.mrb[14].mxu1 }
 0x1e2   :  { %v488_v39 = vadd.f32 %v487_v37, %v485_v30  ;;  %v1073_v54 = vpop.f32.mrb[15].mxu1 }
 0x1e3   :  { %v539_v20 = vmul.f32 %v957_v14, %v513_v38  ;;  %v514_v40 = vmul.f32 %v987_v44, %v513_v38 }
 0x1e4   :  { %v489_v24 = vadd.f32 %v488_v39, %v448_v55  ;;  %v490_v41 = vmax.f32 %v1050_v56, %v488_v39 }
 0x1e5   :  { %v540_v45 = vadd.f32 %v539_v20, %v1006_v63  ;;  %v515_v29 = vadd.f32 %v514_v40, %v1022_v43 }
 0x1e7   :  { %v541_v46 = vadd.f32 %v963_v18, %v540_v45  ;;  %v516_v26 = vadd.f32 %v994_v48, %v515_v29 }
 0x1e9   :  { %v542_v60 = vmax.f32 %v541_v46, -30.0  ;;  %v517_v47 = vmax.f32 %v516_v26, -30.0 }
 0x1eb   :  { %v543_v49 = vsub.f32 0.0, %v542_v60  ;;  %v518_v50 = vsub.f32 0.0, %v517_v47 }
 0x1ed   :  { %v544_v51 = vmul.f32 1.442695, %v543_v49  ;;  %v519_v52 = vmul.f32 1.442695, %v518_v50 }
 0x1ef   :  { %799 = vpow2.f32 %v544_v51 }
 0x1f0   :  { %801 = vpow2.f32 %v519_v52 }
 0x1f9   :  { %v800_v63 = vpop.eup %799 }
 0x1fa   :  { %v802_v43 = vpop.eup %801  ;;  %v546_v55 = vadd.f32 1.0, %v800_v63 }
 0x1fb   :  { %v521_v56 = vadd.f32 1.0, %v802_v43 }
 0x1fc   :  { %803 = vrcp.f32 %v546_v55 }
 0x1fd   :  { %805 = vrcp.f32 %v521_v56 }
 0x206   :  { %v804_v57 = vpop.eup %803 }
 0x207   :  { %v806_v58 = vpop.eup %805  ;;  %v548_v1 = vmul.f32 %v804_v57, %v546_v55 }
 0x208   :  { %v523_v2 = vmul.f32 %v806_v58, %v521_v56 }
 0x209   :  { %v549_v31 = vsub.f32 2.0, %v548_v1 }
 0x20a   :  { %v524_v3 = vsub.f32 2.0, %v523_v2 }
 0x20b   :  { %v550_v59 = vmul.f32 %v804_v57, %v549_v31 }
 0x20c   :  { %v525_v4 = vmul.f32 %v806_v58, %v524_v3 }
 0x20d   :  { %v552_v5 = vsub.f32 1.0, %v550_v59  ;;  %v551_v6 = vmul.f32 %v550_v59, %v513_v38 }
 0x20e   :  { %v526_v9 = vmul.f32 %v525_v4, %v513_v38  ;;  %v527_v61 = vsub.f32 1.0, %v525_v4 }
 0x20f   :  { %v553_v10 = vmul.f32 %v552_v5, %v1004_v62 }
 0x210   :  { %v528_v0 = vmul.f32 %v527_v61, %v1034_v21 }
 0x211   :  { %v554_v11 = vadd.f32 %v553_v10, %v551_v6 }
 0x212   :  { %v529_v12 = vadd.f32 %v528_v0, %v526_v9 }
 0x213   :  { %v580_v28 = vmul.f32 %v957_v14, %v554_v11  ;;  %v555_v13 = vmul.f32 %v987_v44, %v554_v11 }
 0x214   :  { %v530_v33 = vadd.f32 %v529_v12, %v489_v24  ;;  %v1079_v15 = vmax.f32 %v490_v41, %v529_v12 }
 0x215   :  { %v581_v16 = vadd.f32 %v580_v28, %v1038_v23  ;;  %v556_v17 = vadd.f32 %v555_v13, %v1044_v25 }
 0x217   :  { %v582_v19 = vadd.f32 %v963_v18, %v581_v16  ;;  %v557_v27 = vadd.f32 %v994_v48, %v556_v17 }
 0x219   :  { %v583_v62 = vmax.f32 %v582_v19, -30.0  ;;  %v558_v30 = vmax.f32 %v557_v27, -30.0 }
 0x21b   :  { %v584_v21 = vsub.f32 0.0, %v583_v62  ;;  %v559_v35 = vsub.f32 0.0, %v558_v30 }
 0x21d   :  { %v585_v36 = vmul.f32 1.442695, %v584_v21  ;;  %v560_v37 = vmul.f32 1.442695, %v559_v35 }
 0x21f   :  { %807 = vpow2.f32 %v585_v36 }
 0x220   :  { %809 = vpow2.f32 %v560_v37 }
 0x229   :  { %v808_v38 = vpop.eup %807 }
 0x22a   :  { %v810_v39 = vpop.eup %809  ;;  %v587_v20 = vadd.f32 1.0, %v808_v38 }
 0x22b   :  { %v562_v40 = vadd.f32 1.0, %v810_v39 }
 0x22c   :  { %811 = vrcp.f32 %v587_v20 }
 0x22d   :  { %813 = vrcp.f32 %v562_v40 }
 0x236   :  { %v812_v23 = vpop.eup %811 }
 0x237   :  { %v814_v25 = vpop.eup %813  ;;  %v589_v24 = vmul.f32 %v812_v23, %v587_v20 }
 0x238   :  { %v564_v41 = vmul.f32 %v814_v25, %v562_v40 }
 0x239   :  { %v590_v45 = vsub.f32 2.0, %v589_v24 }
 0x23a   :  { %v565_v29 = vsub.f32 2.0, %v564_v41 }
 0x23b   :  { %v591_v46 = vmul.f32 %v812_v23, %v590_v45 }
 0x23c   :  { %v566_v26 = vmul.f32 %v814_v25, %v565_v29 }
 0x23d   :  { %v593_v60 = vsub.f32 1.0, %v591_v46  ;;  %v592_v47 = vmul.f32 %v591_v46, %v554_v11 }
 0x23e   :  { %v567_v49 = vmul.f32 %v566_v26, %v554_v11  ;;  %v568_v50 = vsub.f32 1.0, %v566_v26 }
 0x23f   :  { %v594_v51 = vmul.f32 %v593_v60, %v1036_v22  ;;  %v738_v60 = vld [vmem:[%s1122_s4 + $0x1] ss:$0 sm:$0xff] }
 0x240   :  { %v569_v52 = vmul.f32 %v568_v50, %v1056_v7 }
 0x241   :  { %v595_v63 = vadd.f32 %v594_v51, %v592_v47 }
 0x242   :  { %v570_v43 = vadd.f32 %v569_v52, %v567_v49  ;;  %v739_v52 = vld [vmem:[#allocation3] ss:$0 sm:$0xff] }
 0x243   :  { %v621_v55 = vmul.f32 %v957_v14, %v595_v63  ;;  %v596_v56 = vmul.f32 %v987_v44, %v595_v63 }
 0x244   :  { %v571_v57 = vadd.f32 %v570_v43, %v530_v33  ;;  %v572_v58 = vmax.f32 %v1079_v15, %v570_v43 }
 0x245   :  { %v622_v1 = vadd.f32 %v621_v55, %v1042_v34  ;;  %v597_v2 = vadd.f32 %v596_v56, %v1058_v8 }
 0x247   :  { %v623_v31 = vadd.f32 %v963_v18, %v622_v1  ;;  %v598_v3 = vadd.f32 %v994_v48, %v597_v2 }
 0x249   :  { %v624_v22 = vmax.f32 %v623_v31, -30.0  ;;  %v599_v59 = vmax.f32 %v598_v3, -30.0 }
 0x24b   :  { %v625_v7 = vsub.f32 0.0, %v624_v22  ;;  %v600_v4 = vsub.f32 0.0, %v599_v59 }
 0x24d   :  { %v626_v5 = vmul.f32 1.442695, %v625_v7  ;;  %v601_v6 = vmul.f32 1.442695, %v600_v4 }
 0x24f   :  { %815 = vpow2.f32 %v626_v5 }
 0x250   :  { %817 = vpow2.f32 %v601_v6 }
 0x259   :  { %v816_v14 = vpop.eup %815 }
 0x25a   :  { %v818_v9 = vpop.eup %817  ;;  %v628_v61 = vadd.f32 1.0, %v816_v14 }
 0x25b   :  { %v603_v10 = vadd.f32 1.0, %v818_v9 }
 0x25c   :  { %819 = vrcp.f32 %v628_v61 }
 0x25d   :  { %821 = vrcp.f32 %v603_v10 }
 0x266   :  { %v820_v34 = vpop.eup %819 }
 0x267   :  { %v822_v8 = vpop.eup %821  ;;  %v630_v0 = vmul.f32 %v820_v34, %v628_v61 }
 0x268   :  { %v605_v18 = vmul.f32 %v822_v8, %v603_v10 }
 0x269   :  { %v631_v11 = vsub.f32 2.0, %v630_v0 }
 0x26a   :  { %v606_v12 = vsub.f32 2.0, %v605_v18 }
 0x26b   :  { %v632_v28 = vmul.f32 %v820_v34, %v631_v11 }
 0x26c   :  { %v607_v13 = vmul.f32 %v822_v8, %v606_v12 }
 0x26d   :  { %v633_v33 = vmul.f32 %v632_v28, %v595_v63  ;;  %v634_v15 = vsub.f32 1.0, %v632_v28 }
 0x26e   :  { %v608_v16 = vmul.f32 %v607_v13, %v595_v63  ;;  %v609_v17 = vsub.f32 1.0, %v607_v13 }
 0x26f   :  { %v635_v19 = vmul.f32 %v634_v15, %v1040_v32 }
 0x270   :  { %v610_v27 = vmul.f32 %v609_v17, %v1069_v42 }
 0x271   :  { %v636_v62 = vadd.f32 %v635_v19, %v633_v33 }
 0x272   :  { %v611_v30 = vadd.f32 %v610_v27, %v608_v16 }
 0x273   :  { %v637_v21 = vmul.f32 %v987_v44, %v636_v62 }
 0x274   :  { %v612_v35 = vadd.f32 %v611_v30, %v571_v57  ;;  %v613_v36 = vmax.f32 %v572_v58, %v611_v30 }
 0x275   :  { %v638_v37 = vadd.f32 %v637_v21, %v1071_v53 }
 0x277   :  { %v639_v38 = vadd.f32 %v994_v48, %v638_v37  ;;  %v737_v48 = vld [vmem:[%s1122_s4] ss:$0 sm:$0xff]  ;;  %s853_s4 = scalar_lea.vmem %s698_s29, 128 }
 0x278   :  { %p854_p8 = scmp.ne.s32.totalorder %s698_s29, %s853_s4  ;;  %p859_p10 = scmp.lt.s32.totalorder %s853_s4, %s853_s4 }
 0x279   :  { %v640_v39 = vmax.f32 %v639_v38, -30.0 }
 0x27a   :  { %p860_p11 = por %p859_p10, %p858_p9 }
 0x27b   :  { %v641_v20 = vsub.f32 0.0, %v640_v39 }
 0x27c   :  { %p861_p12 = pnand %p860_p11, %p854_p8 }
 0x27d   :  { %v642_v40 = vmul.f32 1.442695, %v641_v20 }
 0x27f   :  { %823 = vpow2.f32 %v642_v40 }
 0x289   :  { %v824_v23 = vpop.eup %823 }
 0x28a   :  { %v644_v25 = vadd.f32 1.0, %v824_v23 }
 0x28c   :  { %825 = vrcp.f32 %v644_v25 }
 0x296   :  { %v826_v32 = vpop.eup %825 }
 0x297   :  { %v646_v24 = vmul.f32 %v826_v32, %v644_v25 }
 0x299   :  { %v647_v42 = vsub.f32 2.0, %v646_v24 }
 0x29b   :  { %v648_v41 = vmul.f32 %v826_v32, %v647_v42 }
 0x29d   :  { %v649_v45 = vmul.f32 %v648_v41, %v636_v62  ;;  %v650_v29 = vsub.f32 1.0, %v648_v41 }
 0x29f   :  { %v651_v44 = vmul.f32 %v650_v29, %v1073_v54 }
 0x2a1   :  { %v652_v46 = vadd.f32 %v651_v44, %v649_v45 }
 0x2a3   :  { %v653_v26 = vadd.f32 %v652_v46, %v612_v35  ;;  %v654_v53 = vmax.f32 %v613_v36, %v652_v46 }
 0x2a5   :  { %v665_v47 = vmul.f32 0.125, %v653_v26  ;;  %v667_v50 = vmul.f32 %v738_v60, %v654_v53 }
 0x2a7   :  { %v666_v49 = vmul.f32 %v737_v48, %v665_v47 }
 0x2a9   :  { %v668_v51 = vadd.f32 %v667_v50, %v666_v49 }
 0x2ab   :  { %669 = vadd.xlane.f32.xlu0 %v668_v51 }
 0x338   :  { %v670_v63 = vpop.xlane.xlu0 %669 }
 0x339   :  { %v678_v43 = vadd.f32 %v739_v52, %v670_v63 }
 0x33b   :  { %v740_v54 = vmul.f32 -1.442695, %v678_v43 }
 0x33d   :  { %827 = vpow2.f32 %v740_v54 }
 0x347   :  { %v828_v55 = vpop.eup %827 }
 0x348   :  { %v682_v56 = vadd.f32 1.0, %v828_v55 }
 0x34a   :  { %829 = vrcp.f32 %v682_v56 }
 0x354   :  { %v830_v57 = vpop.eup %829 }
 0x355   :  { %687 = vperm.xlu0 %746, %v830_v57  }
 0x3d4   :  { %v688_v58 = vpop.permute.xlu0 %687 }
 0x3d5   :  { %690 = vst [vmem:[#allocation7] sm:$0xff] %v688_v58 }
 0x3d6   :  { %864 = shalt.err (!%p861_p12)
}
 0x3d7   :  { %s865_s5 = scalar_lea.hbm %s1124_s6, 128 }
 0x3d8   :  { %p866_p13 = scmp.ne.s32.totalorder %s1124_s6, %s865_s5  ;;  %p869_p0 = scmp.lt.u32.totalorder %s865_s5, %s1124_s6 }
 0x3da   :  { %p871_p1 = pnand %p869_p0, %p866_p13 }
 0x3dc   :  { %874 = shalt.err (!%p871_p1)
}
 0x3dd   :  { %700 = dma.vmem_to_hbm [thread:$0]  %s698_s29, 128, %s1124_s6, [#allocation6]  }
 0x3de   :  { %877 = dma.done.wait [#allocation6], 128  }
 0x3df   :  { %878 = vsyncadd [#allocation6], 4294967168 }
 0x3e0   :  { %704 = vsyncpa [#allocation5], 1 }
 0x3e1   :  { %705 = vsyncpa [#allocation6], 1 }

</bundles_post_ra>
